<compile_context>
chip_gen: v7x
topology: tpu7x:2x2x1
jax: 0.10.0
libtpu: 0.0.40
codegen_flags: <defaults>
</compile_context>

<pallas_src>
import functools

import jax
import jax.numpy as jnp
from jax.experimental import pallas as pl
from jax.experimental.pallas import tpu as pltpu

NUM_CLASSES = 80
FEAT_DIM = 80 + 79          # 159
C_PAD = 128                 # padded class (lane) dim: one full lane tile
MAX_TB = 2048               # max batch-tile rows (f32 tiles ~1.3 MiB x + 1 MiB out)


def _round_up(n, m):
    return ((n + m - 1) // m) * m


def _cdiv(a, b):
    return -(-a // b)


def _linear_bias_kernel(x_ref, w_ref, b_ref, o_ref):
    # x_ref: (tb, F)  w_ref: (F, C_PAD)  b_ref: (1, C_PAD)  o_ref: (tb, C_PAD)
    acc = jnp.dot(x_ref[...], w_ref[...], preferred_element_type=jnp.float32)
    o_ref[...] = (acc + b_ref[...]).astype(o_ref.dtype)


def prepare_params(weight, bias, use_bf16=False):
    """Pack nn.Linear params once (hoisted out of the per-call path).

    weight: (num_classes, feat_dim) f32
    bias:   (num_classes,)          f32
    returns (w_packed: (feat_dim, C_PAD), bias_packed: (1, C_PAD))
    """
    C, F = weight.shape
    w_dtype = jnp.bfloat16 if use_bf16 else jnp.float32
    w_packed = jnp.pad(weight.T.astype(w_dtype), ((0, 0), (0, C_PAD - C)))
    # Bias stays f32: it is added to the f32 MXU accumulator in-kernel.
    bias_packed = jnp.pad(bias.astype(jnp.float32), (0, C_PAD - C))[None, :]
    return w_packed, bias_packed


def _choose_batch_tile(B, use_bf16):
    """Balanced batch tiles; >=2 grid programs for larger B (v7x megacore)."""
    sublane = 16 if use_bf16 else 8   # bf16 min sublane tile is 16
    n_tiles = max(_cdiv(B, MAX_TB), 1)
    if B > 512:
        n_tiles = max(n_tiles, 2)     # give v7x's second TensorCore work
    tb = _round_up(_cdiv(B, n_tiles), sublane)
    b_pad = tb * n_tiles
    return tb, b_pad


@functools.partial(jax.jit, static_argnames=("use_bf16", "min_pallas_batch"))
def joint_classifier_forward(x, w_packed, bias_packed, use_bf16=False,
                             min_pallas_batch=256):
    """x: (B, feat_dim); (w_packed, bias_packed) from prepare_params()."""
    B, F = x.shape
    x_dtype = jnp.bfloat16 if use_bf16 else jnp.float32
    out_dtype = jnp.bfloat16 if use_bf16 else jnp.float32

    if x.dtype != x_dtype:
        x = x.astype(x_dtype)

    # Tiny batches: Pallas launch + padding round trips dominate -> plain XLA dot.
    if B < min_pallas_batch:
        out = (jnp.dot(x, w_packed, preferred_element_type=jnp.float32)
               + bias_packed).astype(out_dtype)
        return out[:, :NUM_CLASSES]

    tb, b_pad = _choose_batch_tile(B, use_bf16)
    if b_pad != B:
        x = jnp.pad(x, ((0, b_pad - B), (0, 0)))   # minimal batch-only padding

    grid = (b_pad // tb,)

    itemsize = 2 if use_bf16 else 4
    cost = pl.CostEstimate(
        flops=2 * b_pad * F * C_PAD,
        transcendentals=0,
        bytes_accessed=(
            b_pad * F * itemsize                      # x stream
            + F * C_PAD * itemsize                    # resident weight
            + C_PAD * 4                               # bias
            + b_pad * C_PAD * itemsize                # output stream
        ),
    )

    out = pl.pallas_call(
        _linear_bias_kernel,
        out_shape=jax.ShapeDtypeStruct((b_pad, C_PAD), out_dtype),
        grid_spec=pltpu.PrefetchScalarGridSpec(
            num_scalar_prefetch=0,
            grid=grid,
            in_specs=[
                pl.BlockSpec((tb, F), lambda i: (i, 0)),        # x tile (unpadded K)
                pl.BlockSpec((F, C_PAD), lambda i: (0, 0)),     # packed weight (resident)
                pl.BlockSpec((1, C_PAD), lambda i: (0, 0)),     # bias row (resident)
            ],
            out_specs=pl.BlockSpec((tb, C_PAD), lambda i: (i, 0)),
        ),
        compiler_params=pltpu.CompilerParams(
            dimension_semantics=("parallel",),
            vmem_limit_bytes=32 * 1024 * 1024,   # explicit: v5e's scoped default is 16 MiB
        ),
        cost_estimate=cost,
    )(x, w_packed, bias_packed)

    # Slice away batch/class padding so no padded lanes leak downstream.
    return out[:B, :NUM_CLASSES]


def init_params(key, num_classes=NUM_CLASSES, feat_dim=FEAT_DIM):
    # Deterministic synthetic init matching nn.Linear's default
    # uniform(-1/sqrt(in), 1/sqrt(in)).
    kw, kb = jax.random.split(key)
    bound = 1.0 / jnp.sqrt(jnp.float32(feat_dim))
    weight = jax.random.uniform(
        kw, (num_classes, feat_dim), jnp.float32, minval=-bound, maxval=bound
    )
    bias = jax.random.uniform(
        kb, (num_classes,), jnp.float32, minval=-bound, maxval=bound
    )
    return weight, bias


if __name__ == "__main__":
    key = jax.random.PRNGKey(0)
    k_x, k_x2, k_p = jax.random.split(key, 3)

    weight, bias = init_params(k_p)
    w_packed, bias_packed = prepare_params(weight, bias)   # one-time packing

    # Small batch, forced through the Pallas kernel (min_pallas_batch=0).
    batch = 8
    x = jax.random.normal(k_x, (batch, FEAT_DIM), jnp.float32)
    out = joint_classifier_forward(x, w_packed, bias_packed, min_pallas_batch=0)
    out = jax.block_until_ready(out)
    ref = x @ weight.T + bias
    assert out.shape == (batch, NUM_CLASSES)
    assert jnp.allclose(out, ref, atol=1e-4, rtol=1e-4)

    # Slightly larger batch to exercise balanced tiling + batch padding.
    batch2 = 200
    x2 = jax.random.normal(k_x2, (batch2, FEAT_DIM), jnp.float32)
    out2 = joint_classifier_forward(x2, w_packed, bias_packed, min_pallas_batch=0)
    out2 = jax.block_until_ready(out2)
    ref2 = x2 @ weight.T + bias
    assert out2.shape == (batch2, NUM_CLASSES)
    assert jnp.allclose(out2, ref2, atol=1e-4, rtol=1e-4)

    print("KERNEL_OK")
</pallas_src>

<mosaic_0001>
module attributes {stable_mosaic.version = 11 : i64} {
  func.func @_linear_bias_kernel(%arg0: i32, %arg1: memref<8x159xf32, #tpu.memory_space<vmem>>, %arg2: memref<159x128xf32, #tpu.memory_space<vmem>>, %arg3: memref<1x128xf32, #tpu.memory_space<vmem>>, %arg4: memref<8x128xf32, #tpu.memory_space<vmem>>) attributes {dimension_semantics = [#tpu.dimension_semantics<parallel>], iteration_bounds = array<i64: 1>, scalar_prefetch = 0 : i64, scratch_operands = 0 : i64, tpu.core_type = #tpu.core_type<tc>, window_params = [{transform_indices = @transform_0, window_bounds = array<i64: 8, 159>}, {pipeline_mode = #tpu.pipeline_mode<synchronous>, transform_indices = @transform_1, window_bounds = array<i64: 159, 128>}, {pipeline_mode = #tpu.pipeline_mode<synchronous>, transform_indices = @transform_2, window_bounds = array<i64: 1, 128>}, {transform_indices = @transform_3, window_bounds = array<i64: 8, 128>}]} {
    %c0 = arith.constant 0 : index
    %c0_0 = arith.constant 0 : index
    %0 = vector.load %arg1[%c0, %c0_0] : memref<8x159xf32, #tpu.memory_space<vmem>>, vector<8x159xf32>
    %c0_1 = arith.constant 0 : index
    %c0_2 = arith.constant 0 : index
    %1 = vector.load %arg2[%c0_1, %c0_2] : memref<159x128xf32, #tpu.memory_space<vmem>>, vector<159x128xf32>
    %cst = arith.constant dense<0.000000e+00> : vector<8x128xf32>
    %2 = tpu.matmul %0, %1, %cst {dimension_numbers = #tpu.dot_dimension_numbers<[1], [0], [0], [1], [0, 0, 1, 1], [], []>} : vector<8x159xf32>, vector<159x128xf32>, vector<8x128xf32> -> vector<8x128xf32>
    %c0_3 = arith.constant 0 : index
    %c0_4 = arith.constant 0 : index
    %3 = vector.load %arg3[%c0_3, %c0_4] : memref<1x128xf32, #tpu.memory_space<vmem>>, vector<1x128xf32>
    %4 = vector.broadcast %3 : vector<1x128xf32> to vector<8x128xf32>
    %5 = arith.addf %2, %4 : vector<8x128xf32>
    %c0_5 = arith.constant 0 : index
    %c0_6 = arith.constant 0 : index
    %6 = vector.load %arg4[%c0_5, %c0_6] : memref<8x128xf32, #tpu.memory_space<vmem>>, vector<8x128xf32>
    tpu.vector_store %arg4[%c0_5, %c0_6], %5 {strides = array<i32>} : memref<8x128xf32, #tpu.memory_space<vmem>>, vector<8x128xf32>,
    return
  }
  func.func @transform_0(%arg0: i32) -> (i32, i32) {
    %c0_i32 = arith.constant 0 : i32
    %c0_i32_0 = arith.constant 0 : i32
    return %arg0, %c0_i32 : i32, i32
  }
  func.func @transform_1(%arg0: i32) -> (i32, i32) {
    %c0_i32 = arith.constant 0 : i32
    %c0_i32_0 = arith.constant 0 : i32
    %c0_i32_1 = arith.constant 0 : i32
    return %c0_i32, %c0_i32_0 : i32, i32
  }
  func.func @transform_2(%arg0: i32) -> (i32, i32) {
    %c0_i32 = arith.constant 0 : i32
    %c0_i32_0 = arith.constant 0 : i32
    %c0_i32_1 = arith.constant 0 : i32
    return %c0_i32, %c0_i32_0 : i32, i32
  }
  func.func @transform_3(%arg0: i32) -> (i32, i32) {
    %c0_i32 = arith.constant 0 : i32
    %c0_i32_0 = arith.constant 0 : i32
    return %arg0, %c0_i32 : i32, i32
  }
}

</mosaic_0001>

<bundles_post_ra>
// kernel: joint_classifier_forward.1
= control target key start
LH: loop header
LB: loop body
LE: loop exit
PB: predicated region body
PF: predicated region fallthrough
CT: control target
= control target key end

     0   :  { %8 = vsyncpa [#allocation3], 0  ;;  %s351_s0 = inlined_call_operand.hbm [shape: f32[8,159], index: 0, kind: input, shape index: {}]   ;;  %s352_s1 = inlined_call_operand.hbm [shape: f32[159,128], index: 1, kind: input, shape index: {}]   ;;  %s353_s2 = inlined_call_operand.vmem [shape: f32[1,128], index: 2, kind: input, shape index: {}]   ;;  %s354_s3 = inlined_call_operand.hbm [shape: f32[8,128], index: 3, kind: output, shape index: {}]  }
   0x1   :  { %9 = vsyncpa [#allocation6], 0 }
   0x2   :  { %10 = vsyncpa [#allocation4], 0  ;;  %s278_s12 = smov [#allocation2]   ;;  %s279_s14 = smov [#allocation5]  }
   0x3   :  { %s17_s13 = sshll.u32 %s278_s12, 4  ;;  %s26_s15 = sshll.u32 %s279_s14, 4  ;;  %s18_s13 = int_to_ptr.vmem [resolvable:$true] %s17_s13  ;;  %s305_s15 = int_to_ptr.vmem [resolvable:$true] %s26_s15 }
   0x4   :  { %s206_s18 = scalar_lea.hbm %s351_s0, 256 }
   0x5   :  { %p207_p0 = scmp.ne.s32.totalorder %s351_s0, %s206_s18  ;;  %p210_p1 = scmp.lt.u32.totalorder %s206_s18, %s351_s0 }
   0x7   :  { %p212_p2 = pnand %p210_p1, %p207_p0 }
   0x9   :  { %215 = shalt.err (!%p212_p2)
}
   0xa   :  { %s216_s23 = scalar_lea.vmem %s18_s13, 256  ;;  %p221_p4 = scmp.lt.s32.totalorder %s18_s13, %s18_s13 }
   0xb   :  { %p217_p3 = scmp.ne.s32.totalorder %s18_s13, %s216_s23  ;;  %p222_p5 = scmp.lt.s32.totalorder %s216_s23, %s216_s23 }
   0xd   :  { %p223_p6 = por %p222_p5, %p221_p4 }
   0xf   :  { %p224_p7 = pnand %p223_p6, %p217_p3 }
  0x11   :  { %227 = shalt.err (!%p224_p7)
}
  0x12   :  { %20 = dma.hbm_to_vmem [thread:$0]  %s351_s0, 256, %s18_s13, [#allocation3]  }
  0x13   :  { %s228_s28 = scalar_lea.hbm %s352_s1, 2560 }
  0x14   :  { %p229_p8 = scmp.ne.s32.totalorder %s352_s1, %s228_s28  ;;  %p232_p9 = scmp.lt.u32.totalorder %s228_s28, %s352_s1 }
  0x16   :  { %p234_p10 = pnand %p232_p9, %p229_p8 }
  0x18   :  { %237 = shalt.err (!%p234_p10)
}
  0x19   :  { %s238_s6 = scalar_lea.vmem %s305_s15, 2560  ;;  %p243_p12 = scmp.lt.s32.totalorder %s305_s15, %s305_s15 }
  0x1a   :  { %p239_p11 = scmp.ne.s32.totalorder %s305_s15, %s238_s6  ;;  %p244_p13 = scmp.lt.s32.totalorder %s238_s6, %s238_s6 }
  0x1c   :  { %p245_p0 = por %p244_p13, %p243_p12 }
  0x1e   :  { %p246_p1 = pnand %p245_p0, %p239_p11 }
  0x20   :  { %249 = shalt.err (!%p246_p1)
}
  0x21   :  { %s280_s0 = smov 128   ;;  %s281_s7 = smov 8  }
  0x22   :  { %32 = dma.hbm_to_vmem [thread:$0]  %s352_s1, 2560, %s305_s15, [#allocation6], %s280_s0, %s280_s0, %s281_s7  }
  0x23   :  { %272 = dma.done.wait [#allocation3], 256  }
  0x24   :  { %273 = vsyncadd [#allocation3], 4294967040 }
  0x25   :  { %274 = dma.done.wait [#allocation6], 2560  }
  0x26   :  { %275 = vsyncadd [#allocation6], 4294964736  ;;  %v282_v0 = vmov 0.0|0.0   ;;  %v43_v1 = vld [vmem:[#allocation5] sm:$0xff]  ;;  %v44_v2 = vld [vmem:[#allocation5 + $0x8] sm:$0xff]  ;;  %vm70_vm0 = vcmask 252928  }
  0x27   :  { %168 = vmatprep.subr.bf16.mxu0 %v282_v0  ;;  %v45_v3 = vld [vmem:[#allocation5 + $0x10] sm:$0xff]  ;;  %v169_v4 = vpack.c.bf16 %v44_v2, %v43_v1  ;;  %v46_v5 = vld [vmem:[#allocation5 + $0x18] sm:$0xff]  ;;  %v47_v7 = vld [vmem:[#allocation5 + $0x20] sm:$0xff]  ;;  %vm74_vm1 = vcmask 1046528   ;;  %vm283_vm2 = vmmov 1   ;;  %s284_s11 = smov [#allocation7]  }
  0x28   :  { %v172_v6 = vpack.c.bf16 %v46_v5, %v45_v3  ;;  %v48_v8 = vld [vmem:[#allocation5 + $0x28] sm:$0xff]  ;;  %v42_v9 = vld [vmem:[#allocation2 + $0x8] sm:$0xff]  ;;  %v49_v11 = vld [vmem:[#allocation5 + $0x30] sm:$0xff]  ;;  %s155_s12 = sshll.u32 %s284_s11, 4  ;;  %s156_s12 = int_to_ptr.vmem [resolvable:$true] %s155_s12 }
  0x29   :  { %170 = vmatpush1.bf16.msra.mxu0 %v169_v4  ;;  %v175_v10 = vpack.c.bf16 %v48_v8, %v47_v7  ;;  %167 = vmatprep.mubr.msk.f32.mxu0 %vm70_vm0, %v42_v9  ;;  %v50_v12 = vld [vmem:[#allocation5 + $0x38] sm:$0xff]  ;;  %v51_v14 = vld [vmem:[#allocation5 + $0x40] sm:$0xff]  ;;  %v52_v15 = vld [vmem:[#allocation5 + $0x48] sm:$0xff]  ;;  %s250_s13 = scalar_lea.vmem %s156_s12, 128  ;;  %p255_p3 = scmp.lt.s32.totalorder %s156_s12, %s156_s12 }
  0x2a   :  { %171 = vmatprep.subr.bf16.mxu0 %v282_v0  ;;  %v178_v13 = vpack.c.bf16 %v50_v12, %v49_v11  ;;  %v181_v16 = vpack.c.bf16 %v52_v15, %v51_v14  ;;  %v53_v17 = vld [vmem:[#allocation5 + $0x50] sm:$0xff]  ;;  %v54_v18 = vld [vmem:[#allocation5 + $0x58] sm:$0xff]  ;;  %v55_v20 = vld [vmem:[#allocation5 + $0x60] sm:$0xff]  ;;  %p251_p2 = scmp.ne.s32.totalorder %s156_s12, %s250_s13  ;;  %p256_p4 = scmp.lt.s32.totalorder %s250_s13, %s250_s13 }
  0x2b   :  { %v184_v19 = vpack.c.bf16 %v54_v18, %v53_v17  ;;  %v56_v21 = vld [vmem:[#allocation5 + $0x68] sm:$0xff]  ;;  %v57_v23 = vld [vmem:[#allocation5 + $0x70] sm:$0xff]  ;;  %v58_v24 = vld [vmem:[#allocation5 + $0x78] sm:$0xff] }
  0x2c   :  { %v187_v22 = vpack.c.bf16 %v56_v21, %v55_v20  ;;  %v190_v25 = vpack.c.bf16 %v58_v24, %v57_v23  ;;  %v59_v26 = vld [vmem:[#allocation5 + $0x80] sm:$0xff]  ;;  %v60_v27 = vld [vmem:[#allocation5 + $0x88] sm:$0xff]  ;;  %v61_v29 = vld [vmem:[#allocation5 + $0x90] sm:$0xff]  ;;  %p257_p5 = por %p256_p4, %p255_p3 }
  0x2d   :  { %173 = vmatpush1.bf16.msra.mxu0 %v172_v6  ;;  %v193_v28 = vpack.c.bf16 %v60_v27, %v59_v26  ;;  %v62_v30 = vld [vmem:[#allocation5 + $0x98] sm:$0x7f]  ;;  %vm197_vm3 = vmpackc.low %vm74_vm1, %vm283_vm2  ;;  %v41_v32 = vld [vmem:[#allocation2] sm:$0xff] }
  0x2e   :  { %174 = vmatprep.subr.bf16.mxu0 %v282_v0  ;;  %v196_v31 = vpack.c.bf16 %v62_v30, %v61_v29  ;;  %v165_v33 = vld [vmem:[%s353_s2] ss:$0 sm:$0xff]  ;;  %p258_p6 = pnand %p257_p5, %p251_p2 }
  0x31   :  { %176 = vmatpush1.bf16.msra.mxu0 %v175_v10 }
  0x32   :  { %177 = vmatprep.subr.bf16.mxu0 %v282_v0 }
  0x35   :  { %179 = vmatpush1.bf16.msra.mxu0 %v178_v13 }
  0x36   :  { %180 = vmatprep.subr.bf16.mxu0 %v282_v0 }
  0x39   :  { %182 = vmatpush1.bf16.msra.mxu0 %v181_v16 }
  0x3a   :  { %183 = vmatprep.subr.bf16.mxu0 %v282_v0 }
  0x3d   :  { %185 = vmatpush1.bf16.msra.mxu0 %v184_v19 }
  0x3e   :  { %186 = vmatprep.subr.bf16.mxu0 %v282_v0 }
  0x41   :  { %188 = vmatpush1.bf16.msra.mxu0 %v187_v22 }
  0x42   :  { %189 = vmatprep.subr.bf16.mxu0 %v282_v0 }
  0x45   :  { %191 = vmatpush1.bf16.msra.mxu0 %v190_v25 }
  0x46   :  { %192 = vmatprep.subr.bf16.mxu0 %v282_v0 }
  0x49   :  { %194 = vmatpush1.bf16.msra.mxu0 %v193_v28 }
  0x4a   :  { %195 = vmatprep.subr.bf16.mxu0 %v282_v0 }
  0x4d   :  { %198 = vmatpush1.bf16.msk.msra.mxu0 %vm197_vm3, %v196_v31 }
  0x50   :  { %143 = vmatmul.mubr.f32.vlgmr.msra.gmra.mrb[0].mxu0 %v41_v32 }
 0x123   :  { %v144_v34 = vpop.f32.mrb[0].mxu0 }
 0x124   :  { %v145_v35 = vadd.f32 %v165_v33, %v144_v34  ;;  %v146_v36 = vpop.f32.mrb[1].mxu0 }
 0x126   :  { %148 = vst [vmem:[#allocation7] sm:$0xff] %v145_v35 }
 0x127   :  { %261 = shalt.err (!%p258_p6)
}
 0x128   :  { %s262_s16 = scalar_lea.hbm %s354_s3, 128 }
 0x129   :  { %p263_p7 = scmp.ne.s32.totalorder %s354_s3, %s262_s16  ;;  %p266_p8 = scmp.lt.u32.totalorder %s262_s16, %s354_s3 }
 0x12b   :  { %p268_p9 = pnand %p266_p8, %p263_p7 }
 0x12d   :  { %271 = shalt.err (!%p268_p9)
}
 0x12e   :  { %158 = dma.vmem_to_hbm [thread:$0]  %s156_s12, 128, %s354_s3, [#allocation4]  }
 0x12f   :  { %276 = dma.done.wait [#allocation4], 128  }
 0x130   :  { %277 = vsyncadd [#allocation4], 4294967168 }
 0x131   :  { %162 = vsyncpa [#allocation3], 1 }
 0x132   :  { %163 = vsyncpa [#allocation6], 1 }
 0x133   :  { %164 = vsyncpa [#allocation4], 1 }

</bundles_post_ra>
